<compile_context>
chip_gen: v5e
topology: v5e:2x2
jax: 0.10.0
libtpu: 0.0.40
codegen_flags: <defaults>
</compile_context>

<pallas_src>
import functools

import jax
import jax.numpy as jnp
import numpy as np
from jax import lax
from jax.experimental import pallas as pl
from jax.experimental.pallas import tpu as pltpu


def _round_up(x: int, m: int) -> int:
    return (x + m - 1) // m * m


# ---------------------------------------------------------------------------
# Kernels
# ---------------------------------------------------------------------------

def _pointwise_kernel(x_ref, w_ref, b_ref, o_ref, *, compute_dtype, precision):
    """kernel_size == 1: plain (C_out, C_in) x (C_in, TL) matmul.

    No halos and no masks are needed: out-of-bounds input columns only feed
    out-of-bounds output columns, which Pallas drops on the masked store.
    """
    x = x_ref[...].astype(compute_dtype)
    acc = jnp.dot(w_ref[...], x, preferred_element_type=jnp.float32,
                  precision=precision)
    o_ref[...] = (acc + b_ref[...]).astype(o_ref.dtype)


def _conv1d_kernel(xl_ref, x_ref, xr_ref, w_ref, b_ref, o_ref, *,
                   K, pad, L, fused, compute_dtype, precision):
    """Same-padding conv tile with in-kernel zero padding.

    xl_ref : (C_in, 128)  input columns [t*TL - 128, t*TL)         (left halo)
    x_ref  : (C_in, TL)   input columns [t*TL,       t*TL + TL)
    xr_ref : (C_in, 128)  input columns [t*TL + TL,  t*TL + TL+128) (right halo)
    w_ref  : (C_out, K*C_in) if fused else (K, C_out, C_in)   (compute dtype)
    b_ref  : (C_out, 1) float32
    o_ref  : (C_out, TL)  output columns [t*TL, t*TL + TL)

    All padding (left zero pad for t == 0, columns >= L, clamped / partial
    halo blocks) is realized by one iota mask on the extended tile, so the
    wrapper never materializes a padded copy of x.
    """
    t = pl.program_id(1)
    c_in, tl = x_ref.shape
    tle = tl + 256

    # Lane-aligned extended tile covering global columns [t*TL-128, t*TL+TL+128).
    x_ext = jnp.concatenate([xl_ref[...], x_ref[...], xr_ref[...]], axis=1)

    # Column j of x_ext is global column g = t*TL - 128 + j; valid iff 0<=g<L.
    j = lax.broadcasted_iota(jnp.int32, (1, tle), 1)
    g = t * tl + (j - 128)
    x_ext = jnp.where((g >= 0) & (g < L), x_ext, 0.0).astype(compute_dtype)

    if fused:
        # Small aligned C_in: one MXU matmul with contraction K*C_in. Tap k is
        # an XLU roll (left shift by s = 128 - pad + k) + aligned [:, :TL].
        parts = []
        for k in range(K):
            s = 128 - pad + k                      # static, 0 < s < 256
            parts.append(pltpu.roll(x_ext, shift=tle - s, axis=1)[:, :tl])
        unfolded = jnp.concatenate(parts, axis=0)  # (K*C_in, TL)
        acc = jnp.dot(w_ref[...], unfolded,
                      preferred_element_type=jnp.float32, precision=precision)
    else:
        # Large / unaligned C_in: K accumulated dots, no unfold materialization
        # (keeps VMEM live set small and avoids the concat's vld/vst traffic).
        acc = jnp.zeros((o_ref.shape[0], tl), jnp.float32)
        for k in range(K):
            s = 128 - pad + k
            shifted = pltpu.roll(x_ext, shift=tle - s, axis=1)[:, :tl]
            acc = acc + jnp.dot(w_ref[k], shifted,
                                preferred_element_type=jnp.float32,
                                precision=precision)

    o_ref[...] = (acc + b_ref[...]).astype(o_ref.dtype)


# ---------------------------------------------------------------------------
# Wrapper
# ---------------------------------------------------------------------------

def again_conv1d(x, weight, bias, *, compute_dtype=None, out_dtype=None,
                 precision=None, tile_l=None, vmem_budget_bytes=None,
                 fused_channel_threshold=64, min_grid_steps=8):
    """Same-padding 1D convolution: (B, C_in, L) -> (B, C_out, L).

    Args:
      x:             (B, C_in, L)
      weight:        (C_out, C_in, K), K odd
      bias:          (C_out,)
      compute_dtype: matmul operand dtype (None -> x.dtype). jnp.bfloat16 is
                     the HBM-bound fast path (f32 MXU accumulation).
      out_dtype:     output dtype (None -> x.dtype).
      precision:     MXU precision (None -> HIGHEST for f32 compute to match
                     the PyTorch module, DEFAULT for bf16 compute).
      tile_l:        optional cap on the length tile (rounded to 128).
    """
    B, C_in, L = x.shape
    C_out, c_in_w, K = weight.shape
    assert c_in_w == C_in
    assert K % 2 == 1, "same-padding path requires odd kernel_size"
    pad = (K - 1) // 2
    assert 2 * pad <= 128, "128-wide halos support kernel_size <= 129"

    compute_dtype = jnp.dtype(x.dtype) if compute_dtype is None else jnp.dtype(compute_dtype)
    out_dtype = jnp.dtype(x.dtype) if out_dtype is None else jnp.dtype(out_dtype)
    if precision is None:
        precision = (lax.Precision.HIGHEST if compute_dtype == jnp.float32
                     else lax.Precision.DEFAULT)

    in_b = jnp.dtype(x.dtype).itemsize
    cdt_b = compute_dtype.itemsize
    out_b = out_dtype.itemsize
    sub = max(1, 32 // cdt_b)                      # sublane packing (8 f32 / 16 bf16)
    # Fused single-dot path only when the contraction would otherwise be tiny
    # AND the in-kernel tap concat is sublane-aligned; otherwise K accumulated
    # dots (preferred for large C_in per review).
    fused = (pad > 0) and (C_in < fused_channel_threshold) and (C_in % sub == 0)

    # ---- VMEM accounting + tile-length selection ---------------------------
    try:
        vmem_cap = int(pltpu.get_tpu_info().vmem_capacity_bytes)
    except Exception:
        vmem_cap = 64 * 1024 * 1024                # v7x-safe fallback
    if vmem_budget_bytes is None:
        vmem_budget_bytes = max(8 << 20, min(vmem_cap // 4, 24 << 20))

    def _est(tl):
        tle = tl + 256
        io = 2 * (C_in * tl * in_b + C_out * tl * out_b)       # double-buffered
        if pad > 0:
            io += 2 * 2 * C_in * 128 * in_b                    # two 128-wide halos
        wb = 2 * C_out * K * C_in * cdt_b + 2 * C_out * 4      # resident w + b
        if pad == 0:
            mid = C_in * tl * cdt_b + C_out * tl * 4
        elif fused:
            mid = (C_in * tle * (in_b + cdt_b)                 # x_ext f32 + cast
                   + 2 * K * C_in * tl * cdt_b                 # parts + unfolded
                   + C_out * tl * 4)                           # f32 acc
        else:
            mid = (C_in * tle * (in_b + cdt_b)
                   + 2 * C_in * tl * cdt_b                     # shifted operands
                   + C_out * tl * 4)
        return io + wb + mid

    L128 = _round_up(L, 128)
    # _est is affine in tl: solve for the largest 128-multiple under budget.
    e1, e2 = _est(128), _est(256)
    slope = max(e2 - e1, 1) / 128.0
    const = e1 - 128 * slope
    cap_tl = int((vmem_budget_bytes - const) / slope) // 128 * 128
    cap_tl = max(128, cap_tl)
    if tile_l is not None:
        cap_tl = min(cap_tl, max(128, _round_up(int(tile_l), 128)))
    cap_tl = min(cap_tl, L128)

    # Balanced tiles (last tile not nearly empty) + enough grid steps to keep
    # both v7x TensorCores / the DMA pipeline busy.
    nt = pl.cdiv(L128, cap_tl)
    if B * nt < min_grid_steps:
        nt = max(nt, min(L128 // 128, pl.cdiv(min_grid_steps, max(B, 1))))
    TL = _round_up(pl.cdiv(L128, nt), 128)
    nt = pl.cdiv(L, TL)

    vmem_limit = int(min(max(32 << 20, _est(TL) * 5 // 4), vmem_cap * 3 // 4))

    # ---- specs --------------------------------------------------------------
    b_in = bias.reshape(C_out, 1).astype(jnp.float32)
    x_main_spec = pl.BlockSpec((None, C_in, TL), lambda b, t: (b, 0, t))
    o_spec = pl.BlockSpec((None, C_out, TL), lambda b, t: (b, 0, t))
    b_spec = pl.BlockSpec((C_out, 1), lambda b, t: (0, 0))

    if pad == 0:
        w_in = weight[:, :, 0].astype(compute_dtype)            # (C_out, C_in)
        in_specs = [x_main_spec,
                    pl.BlockSpec((C_out, C_in), lambda b, t: (0, 0)),
                    b_spec]
        inputs = (x, w_in, b_in)
        kernel = functools.partial(_pointwise_kernel,
                                   compute_dtype=compute_dtype,
                                   precision=precision)
    else:
        if fused:
            # W2[o, k*C_in + c] = W[o, c, k]  (tap-major, matches concat order)
            w_in = jnp.transpose(weight, (0, 2, 1)).reshape(C_out, K * C_in)
        else:
            w_in = jnp.transpose(weight, (2, 0, 1))             # (K, C_out, C_in)
        w_in = w_in.astype(compute_dtype)
        w_ndim = w_in.ndim
        # Resident weight/bias: constant block index -> stays in VMEM. (The
        # second pipeline buffer is accounted for in _est; pl.Buffered(1)
        # single-buffering is left off to keep the build conservative.)
        w_spec = pl.BlockSpec(w_in.shape, lambda b, t: (0,) * w_ndim)

        hs = TL // 128
        n128 = pl.cdiv(L, 128)
        # Left/right 128-wide halos over the SAME unpadded x; index clamped so
        # the block index is always valid, contents fixed up by the in-kernel
        # mask (t == 0 left pad, columns >= L, clamped blocks).
        left_spec = pl.BlockSpec(
            (None, C_in, 128),
            lambda b, t: (b, 0, jnp.maximum(t * hs - 1, 0)))
        right_spec = pl.BlockSpec(
            (None, C_in, 128),
            lambda b, t: (b, 0, jnp.minimum((t + 1) * hs, n128 - 1)))

        in_specs = [left_spec, x_main_spec, right_spec, w_spec, b_spec]
        inputs = (x, x, x, w_in, b_in)
        kernel = functools.partial(_conv1d_kernel, K=K, pad=pad, L=L,
                                   fused=fused, compute_dtype=compute_dtype,
                                   precision=precision)

    return pl.pallas_call(
        kernel,
        out_shape=jax.ShapeDtypeStruct((B, C_out, L), out_dtype),
        grid_spec=pltpu.PrefetchScalarGridSpec(
            num_scalar_prefetch=0,
            grid=(B, nt),
            in_specs=in_specs,
            out_specs=o_spec),
        compiler_params=pltpu.CompilerParams(
            dimension_semantics=("parallel", "parallel"),
            vmem_limit_bytes=vmem_limit),
    )(*inputs)


# ---------------------------------------------------------------------------
# Module-matching init + reference
# ---------------------------------------------------------------------------

def init_params(key, in_channels, out_channels, kernel_size):
    """Mirrors the PyTorch module:
    - weight: Xavier uniform, gain = calculate_gain('linear') = 1.0
    - bias:   Conv1d default, U(-1/sqrt(fan_in), 1/sqrt(fan_in))
    """
    kw, kb = jax.random.split(key)
    fan_in = in_channels * kernel_size
    fan_out = out_channels * kernel_size
    xavier_bound = float(np.sqrt(6.0 / (fan_in + fan_out)))
    weight = jax.random.uniform(
        kw, (out_channels, in_channels, kernel_size),
        minval=-xavier_bound, maxval=xavier_bound, dtype=jnp.float32)
    bias_bound = 1.0 / float(np.sqrt(fan_in))
    bias = jax.random.uniform(
        kb, (out_channels,), minval=-bias_bound, maxval=bias_bound,
        dtype=jnp.float32)
    return weight, bias


def reference_conv1d(x, weight, bias, precision=lax.Precision.HIGHEST):
    pad = (weight.shape[-1] - 1) // 2
    out = lax.conv_general_dilated(
        x, weight, window_strides=(1,), padding=[(pad, pad)],
        dimension_numbers=("NCH", "OIH", "NCH"), precision=precision)
    return out + bias[None, :, None]


if __name__ == "__main__":
    key = jax.random.PRNGKey(0)
    k1, k2, k3, k4, k5, k6, k7, k8 = jax.random.split(key, 8)

    # --- 1. small module-sized shapes: (batch, in_channels, seglen) ----------
    B, C_in, C_out, L, K = 2, 4, 8, 16, 3
    x = jax.random.normal(k1, (B, C_in, L), dtype=jnp.float32)
    w, b = init_params(k2, C_in, C_out, K)
    out = jax.block_until_ready(again_conv1d(x, w, b))
    ref = reference_conv1d(x, w, b)
    np.testing.assert_allclose(np.asarray(out), np.asarray(ref),
                               rtol=1e-4, atol=1e-4)
    assert out.shape == (B, C_out, L) and out.dtype == x.dtype

    # --- 2. bf16-matmul fast path (f32 accumulation), f32 and bf16 output ----
    out_bf = jax.block_until_ready(
        again_conv1d(x, w, b, compute_dtype=jnp.bfloat16))
    xq = x.astype(jnp.bfloat16).astype(jnp.float32)
    wq = w.astype(jnp.bfloat16).astype(jnp.float32)
    refq = reference_conv1d(xq, wq, b)
    np.testing.assert_allclose(np.asarray(out_bf), np.asarray(refq),
                               rtol=2e-3, atol=2e-3)
    out_bf_o = jax.block_until_ready(
        again_conv1d(x, w, b, compute_dtype=jnp.bfloat16,
                     out_dtype=jnp.bfloat16))
    np.testing.assert_allclose(np.asarray(out_bf_o.astype(jnp.float32)),
                               np.asarray(refq), rtol=1e-2, atol=1e-2)

    # --- 3. multi-tile fused path: halos, left/right masking, balanced tiles -
    B2, Ci2, Co2, L2, K2 = 2, 8, 10, 300, 5
    x2 = jax.random.normal(k3, (B2, Ci2, L2), dtype=jnp.float32)
    w2, b2 = init_params(k4, Ci2, Co2, K2)
    out2 = jax.block_until_ready(again_conv1d(x2, w2, b2, tile_l=128))
    ref2 = reference_conv1d(x2, w2, b2)
    np.testing.assert_allclose(np.asarray(out2), np.asarray(ref2),
                               rtol=1e-4, atol=1e-4)

    # --- 4. large-channel path: K accumulated dots, no unfold ----------------
    B3, Ci3, Co3, L3, K3 = 2, 96, 64, 384, 5
    x3 = jax.random.normal(k5, (B3, Ci3, L3), dtype=jnp.float32)
    w3, b3 = init_params(k6, Ci3, Co3, K3)
    out3 = jax.block_until_ready(again_conv1d(x3, w3, b3))
    ref3 = reference_conv1d(x3, w3, b3)
    np.testing.assert_allclose(np.asarray(out3), np.asarray(ref3),
                               rtol=1e-4, atol=1e-4)

    # --- 5. kernel_size == 1 (pointwise path, no halos) ----------------------
    B4, Ci4, Co4, L4 = 2, 8, 16, 200
    x4 = jax.random.normal(k7, (B4, Ci4, L4), dtype=jnp.float32)
    w4, b4 = init_params(k8, Ci4, Co4, 1)
    out4 = jax.block_until_ready(again_conv1d(x4, w4, b4))
    ref4 = reference_conv1d(x4, w4, b4)
    np.testing.assert_allclose(np.asarray(out4), np.asarray(ref4),
                               rtol=1e-4, atol=1e-4)

    print("KERNEL_OK")
</pallas_src>

<mosaic_0001>
module attributes {stable_mosaic.version = 11 : i64} {
  func.func @_conv1d_kernel(%arg0: i32, %arg1: i32, %arg2: memref<1x4x128xf32, #tpu.memory_space<vmem>>, %arg3: memref<1x4x128xf32, #tpu.memory_space<vmem>>, %arg4: memref<1x4x128xf32, #tpu.memory_space<vmem>>, %arg5: memref<3x8x4xf32, #tpu.memory_space<vmem>>, %arg6: memref<8x1xf32, #tpu.memory_space<vmem>>, %arg7: memref<1x8x128xf32, #tpu.memory_space<vmem>>) attributes {dimension_semantics = [#tpu.dimension_semantics<parallel>, #tpu.dimension_semantics<parallel>], iteration_bounds = array<i64: 2, 1>, scalar_prefetch = 0 : i64, scratch_operands = 0 : i64, tpu.core_type = #tpu.core_type<tc>, window_params = [{transform_indices = @transform_0, window_bounds = array<i64: 1, 4, 128>}, {transform_indices = @transform_1, window_bounds = array<i64: 1, 4, 128>}, {transform_indices = @transform_2, window_bounds = array<i64: 1, 4, 128>}, {pipeline_mode = #tpu.pipeline_mode<synchronous>, transform_indices = @transform_3, window_bounds = array<i64: 3, 8, 4>}, {pipeline_mode = #tpu.pipeline_mode<synchronous>, transform_indices = @transform_4, window_bounds = array<i64: 8, 1>}, {transform_indices = @transform_5, window_bounds = array<i64: 1, 8, 128>}]} {
    %c0 = arith.constant 0 : index
    %c0_0 = arith.constant 0 : index
    %c0_1 = arith.constant 0 : index
    %0 = vector.load %arg2[%c0, %c0_0, %c0_1] : memref<1x4x128xf32, #tpu.memory_space<vmem>>, vector<1x4x128xf32>
    %1 = vector.shape_cast %0 : vector<1x4x128xf32> to vector<4x128xf32>
    %c0_2 = arith.constant 0 : index
    %c0_3 = arith.constant 0 : index
    %c0_4 = arith.constant 0 : index
    %2 = vector.load %arg3[%c0_2, %c0_3, %c0_4] : memref<1x4x128xf32, #tpu.memory_space<vmem>>, vector<1x4x128xf32>
    %3 = vector.shape_cast %2 : vector<1x4x128xf32> to vector<4x128xf32>
    %c0_5 = arith.constant 0 : index
    %c0_6 = arith.constant 0 : index
    %c0_7 = arith.constant 0 : index
    %4 = vector.load %arg4[%c0_5, %c0_6, %c0_7] : memref<1x4x128xf32, #tpu.memory_space<vmem>>, vector<1x4x128xf32>
    %5 = vector.shape_cast %4 : vector<1x4x128xf32> to vector<4x128xf32>
    %6 = tpu.concatenate %1, %3, %5 in 1 : vector<4x128xf32>, vector<4x128xf32>, vector<4x128xf32> -> vector<4x384xf32>
    %7 = tpu.iota {dimensions = array<i32: 1>} : vector<1x384xi32>
    %c128_i32 = arith.constant 128 : i32
    %8 = arith.muli %arg1, %c128_i32 : i32
    %c128_i32_8 = arith.constant 128 : i32
    %9 = vector.broadcast %c128_i32_8 : i32 to vector<1x384xi32>
    %10 = arith.subi %7, %9 : vector<1x384xi32>
    %11 = vector.broadcast %8 : i32 to vector<1x384xi32>
    %12 = arith.addi %11, %10 : vector<1x384xi32>
    %c0_i32 = arith.constant 0 : i32
    %13 = vector.broadcast %c0_i32 : i32 to vector<1x384xi32>
    %14 = arith.cmpi sge, %12, %13 : vector<1x384xi32>
    %c16_i32 = arith.constant 16 : i32
    %15 = vector.broadcast %c16_i32 : i32 to vector<1x384xi32>
    %16 = arith.cmpi slt, %12, %15 : vector<1x384xi32>
    %17 = arith.andi %14, %16 : vector<1x384xi1>
    %cst = arith.constant 0.000000e+00 : f32
    %18 = vector.shape_cast %17 : vector<1x384xi1> to vector<1x384xi1>
    %19 = vector.broadcast %18 : vector<1x384xi1> to vector<4x384xi1>
    %20 = vector.broadcast %cst : f32 to vector<4x384xf32>
    %21 = arith.select %19, %6, %20 : vector<4x384xi1>, vector<4x384xf32>
    %cst_9 = arith.constant 0.000000e+00 : f32
    %22 = vector.broadcast %cst_9 : f32 to vector<8x128xf32>
    %c257_i32 = arith.constant 257 : i32
    %23 = tpu.dynamic_rotate %21 by %c257_i32 dim 1 : vector<4x384xf32>, i32 -> vector<4x384xf32>
    %24 = vector.extract_strided_slice %23 {offsets = [0, 0], sizes = [4, 128], strides = [1, 1]} : vector<4x384xf32> to vector<4x128xf32>
    %c0_10 = arith.constant 0 : index
    %c0_11 = arith.constant 0 : index
    %c0_12 = arith.constant 0 : index
    %25 = vector.load %arg5[%c0_10, %c0_11, %c0_12] : memref<3x8x4xf32, #tpu.memory_space<vmem>>, vector<1x8x4xf32>
    %26 = vector.shape_cast %25 : vector<1x8x4xf32> to vector<8x4xf32>
    %cst_13 = arith.constant dense<0.000000e+00> : vector<8x128xf32>
    %27 = tpu.matmul %26, %24, %cst_13 {dimension_numbers = #tpu.dot_dimension_numbers<[1], [0], [0], [1], [0, 0, 1, 1], [], []>, precision = #tpu.contract_precision<fp32>} : vector<8x4xf32>, vector<4x128xf32>, vector<8x128xf32> -> vector<8x128xf32>
    %28 = arith.addf %22, %27 : vector<8x128xf32>
    %c256_i32 = arith.constant 256 : i32
    %29 = tpu.dynamic_rotate %21 by %c256_i32 dim 1 : vector<4x384xf32>, i32 -> vector<4x384xf32>
    %30 = vector.extract_strided_slice %29 {offsets = [0, 0], sizes = [4, 128], strides = [1, 1]} : vector<4x384xf32> to vector<4x128xf32>
    %c1 = arith.constant 1 : index
    %c0_14 = arith.constant 0 : index
    %c0_15 = arith.constant 0 : index
    %31 = vector.load %arg5[%c1, %c0_14, %c0_15] : memref<3x8x4xf32, #tpu.memory_space<vmem>>, vector<1x8x4xf32>
    %32 = vector.shape_cast %31 : vector<1x8x4xf32> to vector<8x4xf32>
    %cst_16 = arith.constant dense<0.000000e+00> : vector<8x128xf32>
    %33 = tpu.matmul %32, %30, %cst_16 {dimension_numbers = #tpu.dot_dimension_numbers<[1], [0], [0], [1], [0, 0, 1, 1], [], []>, precision = #tpu.contract_precision<fp32>} : vector<8x4xf32>, vector<4x128xf32>, vector<8x128xf32> -> vector<8x128xf32>
    %34 = arith.addf %28, %33 : vector<8x128xf32>
    %c255_i32 = arith.constant 255 : i32
    %35 = tpu.dynamic_rotate %21 by %c255_i32 dim 1 : vector<4x384xf32>, i32 -> vector<4x384xf32>
    %36 = vector.extract_strided_slice %35 {offsets = [0, 0], sizes = [4, 128], strides = [1, 1]} : vector<4x384xf32> to vector<4x128xf32>
    %c2 = arith.constant 2 : index
    %c0_17 = arith.constant 0 : index
    %c0_18 = arith.constant 0 : index
    %37 = vector.load %arg5[%c2, %c0_17, %c0_18] : memref<3x8x4xf32, #tpu.memory_space<vmem>>, vector<1x8x4xf32>
    %38 = vector.shape_cast %37 : vector<1x8x4xf32> to vector<8x4xf32>
    %cst_19 = arith.constant dense<0.000000e+00> : vector<8x128xf32>
    %39 = tpu.matmul %38, %36, %cst_19 {dimension_numbers = #tpu.dot_dimension_numbers<[1], [0], [0], [1], [0, 0, 1, 1], [], []>, precision = #tpu.contract_precision<fp32>} : vector<8x4xf32>, vector<4x128xf32>, vector<8x128xf32> -> vector<8x128xf32>
    %40 = arith.addf %34, %39 : vector<8x128xf32>
    %c0_20 = arith.constant 0 : index
    %c0_21 = arith.constant 0 : index
    %41 = vector.load %arg6[%c0_20, %c0_21] : memref<8x1xf32, #tpu.memory_space<vmem>>, vector<8x1xf32>
    %42 = vector.broadcast %41 : vector<8x1xf32> to vector<8x128xf32>
    %43 = arith.addf %40, %42 : vector<8x128xf32>
    %c0_22 = arith.constant 0 : index
    %c0_23 = arith.constant 0 : index
    %c0_24 = arith.constant 0 : index
    %44 = vector.load %arg7[%c0_22, %c0_23, %c0_24] : memref<1x8x128xf32, #tpu.memory_space<vmem>>, vector<1x8x128xf32>
    %45 = vector.shape_cast %44 : vector<1x8x128xf32> to vector<8x128xf32>
    %46 = vector.shape_cast %43 : vector<8x128xf32> to vector<1x8x128xf32>
    tpu.vector_store %arg7[%c0_22, %c0_23, %c0_24], %46 {strides = array<i32>} : memref<1x8x128xf32, #tpu.memory_space<vmem>>, vector<1x8x128xf32>,
    return
  }
  func.func @transform_0(%arg0: i32, %arg1: i32) -> (i32, i32, i32) {
    %c1_i32 = arith.constant 1 : i32
    %0 = arith.muli %arg1, %c1_i32 : i32
    %c1_i32_0 = arith.constant 1 : i32
    %1 = arith.subi %0, %c1_i32_0 : i32
    %c0_i32 = arith.constant 0 : i32
    %2 = arith.maxsi %1, %c0_i32 : i32
    %c0_i32_1 = arith.constant 0 : i32
    %c0_i32_2 = arith.constant 0 : i32
    return %arg0, %c0_i32_1, %2 : i32, i32, i32
  }
  func.func @transform_1(%arg0: i32, %arg1: i32) -> (i32, i32, i32) {
    %c0_i32 = arith.constant 0 : i32
    %c0_i32_0 = arith.constant 0 : i32
    return %arg0, %c0_i32, %arg1 : i32, i32, i32
  }
  func.func @transform_2(%arg0: i32, %arg1: i32) -> (i32, i32, i32) {
    %c1_i32 = arith.constant 1 : i32
    %0 = arith.addi %arg1, %c1_i32 : i32
    %c1_i32_0 = arith.constant 1 : i32
    %1 = arith.muli %0, %c1_i32_0 : i32
    %c0_i32 = arith.constant 0 : i32
    %2 = arith.minsi %1, %c0_i32 : i32
    %c0_i32_1 = arith.constant 0 : i32
    %c0_i32_2 = arith.constant 0 : i32
    return %arg0, %c0_i32_1, %2 : i32, i32, i32
  }
  func.func @transform_3(%arg0: i32, %arg1: i32) -> (i32, i32, i32) {
    %c0_i32 = arith.constant 0 : i32
    %c0_i32_0 = arith.constant 0 : i32
    %c0_i32_1 = arith.constant 0 : i32
    %c0_i32_2 = arith.constant 0 : i32
    return %c0_i32, %c0_i32_0, %c0_i32_1 : i32, i32, i32
  }
  func.func @transform_4(%arg0: i32, %arg1: i32) -> (i32, i32) {
    %c0_i32 = arith.constant 0 : i32
    %c0_i32_0 = arith.constant 0 : i32
    %c0_i32_1 = arith.constant 0 : i32
    return %c0_i32, %c0_i32_0 : i32, i32
  }
  func.func @transform_5(%arg0: i32, %arg1: i32) -> (i32, i32, i32) {
    %c0_i32 = arith.constant 0 : i32
    %c0_i32_0 = arith.constant 0 : i32
    return %arg0, %c0_i32, %arg1 : i32, i32, i32
  }
}

</mosaic_0001>

<bundles_post_ra>
// kernel: tpu_custom_call.1
= control target key start
LH: loop header
LB: loop body
LE: loop exit
PB: predicated region body
PF: predicated region fallthrough
CT: control target
= control target key end

     0   :  { %10 = vsyncpa [#allocation3], 0  ;;  %s1288_s0 = inlined_call_operand.vmem [shape: f32[2,4,16], index: 0, kind: input, shape index: {}]   ;;  %s1289_s1 = inlined_call_operand.vmem [shape: f32[2,4,16], index: 1, kind: input, shape index: {}]   ;;  %s1290_s2 = inlined_call_operand.vmem [shape: f32[2,4,16], index: 2, kind: input, shape index: {}]   ;;  %s1291_s3 = inlined_call_operand.vmem [shape: f32[3,8,4], index: 3, kind: input, shape index: {}]   ;;  %s1292_s4 = inlined_call_operand.vmem [shape: f32[8,1], index: 4, kind: input, shape index: {}]   ;;  %s1293_s5 = inlined_call_operand.hbm [shape: f32[2,8,16], index: 5, kind: output, shape index: {}]  }
   0x1   :  { %12 = vsyncpa [#allocation3 + $0x1], 0  ;;  %s1168_s18 = smov 0   ;;  %s1170_s0 = smov 0  }
   0x2   :  { %s1172_s19 = smov 0   ;;  %s1174_s20 = smov 0  }
   0x3   :  { %s1176_s2 = smov 0   ;;  %s1178_s21 = smov 0  }
   0x4 LB: > { %s976_s22 = sadd.s32 4294967295, %s1132_s21   ;;  %s977_s23 = sadd.s32 4294967294, %s1132_s21   ;;  %s1132_s21 = sphi %s1178_s21, %s18_s21   ;;  %s1128_s2 = sphi %s1176_s2, %s1300_s2   ;;  %s1124_s20 = sphi %s1174_s20, %s1299_s20   ;;  %s1120_s19 = sphi %s1172_s19, %s1298_s19   ;;  %s1116_s0 = sphi %s1170_s0, %s1297_s0   ;;  %s1112_s18 = sphi %s1168_s18, %s1296_s18  }
   0x5   : > { %s30_s24 = sadd.s32 1, %s1128_s2  ;;  %s177_s25 = sadd.s32 1, %s1120_s19 }
   0x6   : > { %p32_p0 = scmp.ge.s32.totalorder %s30_s24, 2  ;;  %p187_p1 = scmp.ne.s32.totalorder %s1120_s19, %s1116_s0 }
   0x7   : > { %p188_p2 = scmp.eq.s32.totalorder %s976_s22, 1  ;;  %p193_p3 = scmp.ne.s32.totalorder %s1116_s0, %s1112_s18 }
   0x8   : > { %s1302_s24 = smov (%p32_p0, %s30_s24), 0  ;;  %p194_p5 = scmp.eq.s32.totalorder %s977_s23, 1 }
   0x9   : > { %p1208_p4 = por %p188_p2, %p187_p1  ;;  %s172_s27 = ssub.s32 %s1128_s2, %s1302_s24 }
   0xa   : > { %p980_p6 = scmp.ge.s32.totalorder %s1132_s21, 1  ;;  %p175_p7 = scmp.eq.s32.totalorder %s172_s27, 0 }
   0xb   : > { %p1215_p8 = por %p194_p5, %p193_p3  ;;  %p260_p9 = scmp.lt.s32.totalorder %s1132_s21, 3 }
   0xc   : > { %s1221_s29 = scalar_select %p175_p7, %s1120_s19, %s177_s25  }
   0xd   : > { %p261_p10 = pnand %p980_p6, %p260_p9 }
   0xe   : > { %p323_p11 = scmp.lt.s32.totalorder (!%p261_p10), %s1124_s20, 1  ;;  %s1135_s30 = smov (!%p261_p10), 1  }
   0xf   : > { %264 = sbr.rel (%p261_p10) target bundleno = 318 (0x13e), region = 40  ;;  %s1136_s11 = smov (!%p261_p10), 127  }
  0x10   : > { %s307_s25 = sand.u32 (!%p261_p10), 1, %s1116_s0   ;;  %s1074_s16 = scalar_lea.hbm (!%p261_p10), %s1293_s5, 16 }
  0x11   : > { %s981_s27 = sshll.u32 (!%p261_p10), %s307_s25, 3 }
  0x12   : > { %s309_s9 = scalar_lea.vmem (!%p261_p10), [#allocation2], %s981_s27 }
  0x14   : > { %v346_v0 = vlaneseq  ;;  %v1134_v1 = vmov 0.0   ;;  %s324_s6 = scalar_select %p323_p11, %s1124_s20, 1  ;;  %vm387_vm1 = vcmask 1043456   ;;  %v987_v7 = vld [vmem:[%s1291_s3 + $0x8] sm:$0xff]  ;;  %vm383_vm2 = vcmask 31744   ;;  %v380_v18 = vld [vmem:[%s1291_s3] sm:$0xff] }
  0x15   : > { %374 = vrot.lane.b32.xlu0 %v1134_v1, %s1135_s30  ;;  %v385_v8 = vsel %vm383_vm2, %v987_v7, 0  ;;  %v538_v19 = vsel %vm383_vm2, %v380_v18, 0  ;;  %v988_v22 = vld [vmem:[%s1291_s3 + $0x10] sm:$0xff]  ;;  %v850_v28 = vld [vmem:[%s1292_s4] sm:$0xff]  ;;  %v1137_v30 = vmov 0  }
  0x16   : > { %v1225_v2 = vand.u32 127, %v346_v0  ;;  %s983_s7 = sshll.u32 %s324_s6, 2  ;;  %v408_v9 = vand.u32 4294901760, %v385_v8  ;;  %v560_v20 = vand.u32 4294901760, %v538_v19  ;;  %v698_v25 = vsel %vm383_vm2, %v988_v22, 0  ;;  %1052 = vset.pattern.permute.xlu2 %v1137_v30  ;;  %1053 = vset.pattern.permute.xlu0 %v1137_v30 }
  0x17   : > { %s329_s10 = scalar_lea.vmem %s1289_s1, %s983_s7  ;;  %v720_v26 = vand.u32 4294901760, %v698_v25  ;;  %853 = vperm.xlu2 %1052, %v850_v28  }
  0x18   : > { %vm360_vm0 = vcmp.lt.s32.totalorder %v1225_v2, 16  ;;  %v344_v3 = vld [vmem:[%s329_s10] sm:$0xf]  ;;  %v409_v10 = vsub.f32 %v385_v8, %v408_v9  ;;  %v561_v21 = vsub.f32 %v538_v19, %v560_v20  ;;  %vm378_vm3 = vcmp.lt.s32.totalorder %v1225_v2, 1  ;;  %s872_s10 = sshll.u32 %s309_s9, 4  ;;  %s873_s10 = int_to_ptr.vmem [resolvable:$true] %s872_s10 }
  0x19   : > { %v372_v4 = vsel %vm360_vm0, %v344_v3, 0.0  ;;  %v721_v33 = vsub.f32 %v698_v25, %v720_v26  ;;  %vm693_vm4 = vcmp.lt.s32.totalorder %v1225_v2, 127 }
  0x1a   : > { %689 = vrot.lane.b32.xlu1 %v372_v4, %s1136_s11  ;;  %v389_v5 = vsel %vm387_vm1, %v372_v4, 0  ;;  %v410_v11 = vand.u32 4294901760, %v409_v10  ;;  %v562_v24 = vand.u32 4294901760, %v561_v21 }
  0x1b   : > { %v406_v6 = vand.u32 4294901760, %v389_v5  ;;  %v722_v38 = vand.u32 4294901760, %v721_v33 }
  0x1c   : > { %v411_v13 = vsub.f32 %v409_v10, %v410_v11  ;;  %v563_v27 = vsub.f32 %v561_v21, %v562_v24 }
  0x1d   : > { %376 = vrot.lane.b32.xlu0 %v372_v4, %s1135_s30  ;;  %407 = vmatpush.msra.mxu0 %v406_v6  ;;  %v433_v12 = vsub.f32 %v389_v5, %v406_v6  ;;  %v723_v44 = vsub.f32 %v721_v33, %v722_v38  ;;  %s990_s30 = sshll.u32 %s1124_s20, 3  ;;  %s859_s20 = scalar_lea.sflag [#allocation3], %s307_s25 }
  0x1e   : > { %483 = vmatpush.msra.mxu3 %v406_v6  ;;  %v412_v15 = vand.u32 4294901760, %v411_v13  ;;  %v564_v35 = vand.u32 4294901760, %v563_v27  ;;  %s870_s8 = scalar_lea.hbm %s1293_s5, %s990_s30 }
  0x1f   : > { %v434_v14 = vand.u32 4294901760, %v433_v12  ;;  %460 = vmatpush.msra.mxu2 %v433_v12  ;;  %487 = vmatmul.f32.vlgmr.msra.gmra.mxu3 %v410_v11  ;;  %v724_v48 = vand.u32 4294901760, %v723_v44 }
  0x20   : > { %463 = vmatmul.f32.vlgmr.msra.gmra.mxu2 %v409_v10  ;;  %413 = vmatmul.f32.vlgmr.msra.gmra.mxu0 %v412_v15 }
  0x21   : > { %v435_v16 = vsub.f32 %v433_v12, %v434_v14  ;;  %509 = vmatpush.msrb.mxu0 %v434_v14 }
  0x22   : > { %691 = vrot.lane.b32.xlu1 %v1134_v1, %s1136_s11  ;;  %s874_s11 = sshll.u32 %s870_s8, 4  ;;  %s875_s11 = int_to_ptr.hbm [resolvable:$true] %s874_s11 }
  0x23   : > { %v436_v17 = vand.u32 4294901760, %v435_v16  ;;  %s1068_s12 = sshra.s32 %s875_s11, 4  ;;  %s1069_s12 = int_to_ptr.hbm [resolvable:$true] %s1068_s12 }
  0x24   : > { %s1070_s13 = scalar_lea.hbm %s1069_s12, 8  ;;  %p1075_p1 = scmp.lt.s32.totalorder %s1069_s12, %s1293_s5 }
  0x25   : > { %437 = vmatpush.msra.mxu1 %v436_v17  ;;  %p1071_p12 = scmp.ne.s32.totalorder %s1069_s12, %s1070_s13  ;;  %p1076_p2 = scmp.lt.s32.totalorder %s1074_s16, %s1070_s13 }
  0x26   : > { %439 = vmatmul.f32.vlgmr.msra.gmra.mxu1 %v408_v9 }
  0x27   : > { %531 = vmatpush.msrb.mxu1 %v406_v6  ;;  %p1072_p13 = pnand %p1071_p12, %p1208_p4  ;;  %p1077_p3 = por %p1076_p2, %p1075_p1 }
  0x28   : > { %511 = vmatmul.f32.vlgmr.msrb.gmra.mxu0 %v408_v9 }
  0x29   : > { %p1073_p0 = pneg %p1072_p13 }
  0x2b   : > { %p1078_p5 = pnand %p1077_p3, %p1073_p0 }
  0x2e   : > { %533 = vmatmul.f32.vlgmr.msrb.gmra.mxu1 %v408_v9 }
  0x71   : > { %v854_v22 = vpop.permute.xlu2 %853 }
  0x87   : > { %v375_v23 = vpop.permute.xlu0 %374 }
  0x8c   : > { %v690_v29 = vpop.permute.xlu1 %689 }
  0x8f   : > { %v377_v31 = vpop.permute.xlu0 %376 }
  0x90   : > { %v379_v32 = vsel %vm378_vm3, %v375_v23, %v377_v31 }
  0x91   : > { %v541_v34 = vsel %vm387_vm1, %v379_v32, 0 }
  0x92   : > { %v558_v36 = vand.u32 4294901760, %v541_v34 }
  0x94   : > { %v585_v37 = vsub.f32 %v541_v34, %v558_v36  ;;  %559 = vmatpush.msrb.mxu2 %v558_v36  ;;  %635 = vmatpush.msra.mxu1 %v558_v36  ;;  %v692_v39 = vpop.permute.xlu1 %691 }
  0x95   : > { %565 = vmatmul.f32.vlgmr.msrb.gmra.mxu2 %v564_v35  ;;  %639 = vmatmul.f32.vlgmr.msra.gmra.mxu1 %v562_v24  ;;  %v694_v41 = vsel %vm693_vm4, %v690_v29, %v692_v39 }
  0x96   : > { %612 = vmatpush.msra.mxu0 %v585_v37  ;;  %v586_v40 = vand.u32 4294901760, %v585_v37  ;;  %v701_v42 = vsel %vm387_vm1, %v694_v41, 0 }
  0x97   : > { %615 = vmatmul.f32.vlgmr.msra.gmra.mxu0 %v561_v21  ;;  %v718_v45 = vand.u32 4294901760, %v701_v42 }
  0x98   : > { %661 = vmatpush.msra.mxu2 %v586_v40  ;;  %v587_v43 = vsub.f32 %v585_v37, %v586_v40 }
  0x99   : > { %v745_v47 = vsub.f32 %v701_v42, %v718_v45  ;;  %719 = vmatpush.msrb.mxu0 %v718_v45 }
  0x9a   : > { %v588_v46 = vand.u32 4294901760, %v587_v43 }
  0x9b   : > { %772 = vmatpush.msrb.mxu2 %v745_v47  ;;  %v746_v49 = vand.u32 4294901760, %v745_v47 }
  0x9c   : > { %589 = vmatpush.msrb.mxu3 %v588_v46 }
  0x9d   : > { %591 = vmatmul.f32.vlgmr.msrb.gmra.mxu3 %v560_v20  ;;  %663 = vmatmul.f32.vlgmr.msra.gmra.mxu2 %v560_v20  ;;  %v747_v50 = vsub.f32 %v745_v47, %v746_v49  ;;  %v414_v52 = vpop.f32.mrf.mxu0 }
  0x9e   : > { %683 = vmatpush.msra.mxu3 %v558_v36  ;;  %821 = vmatpush.msra.mxu0 %v746_v49 }
  0x9f   : > { %725 = vmatmul.f32.vlgmr.msrb.gmra.mxu0 %v724_v48  ;;  %v748_v51 = vand.u32 4294901760, %v747_v50 }
  0xa0   : > { %795 = vmatpush.msrb.mxu3 %v718_v45 }
  0xa1   : > { %749 = vmatpush.msrb.mxu1 %v748_v51 }
  0xa2   : > { %751 = vmatmul.f32.vlgmr.msrb.gmra.mxu1 %v720_v26  ;;  %v488_v57 = vpop.f32.mrf.mxu3 }
  0xa3   : > { %843 = vmatpush.msra.mxu1 %v718_v45  ;;  %v440_v53 = vpop.f32.mrf.mxu1  ;;  %v464_v54 = vpop.f32.mrf.mxu2 }
  0xa4   : > { %v441_v55 = vadd.f32 %v440_v53, %v414_v52 }
  0xa5   : > { %685 = vmatmul.f32.vlgmr.msra.gmra.mxu3 %v560_v20  ;;  %775 = vmatmul.f32.vlgmr.msrb.gmra.mxu2 %v721_v33  ;;  %v512_v58 = vpop.f32.mrf.mxu0 }
  0xa6   : > { %v465_v56 = vadd.f32 %v464_v54, %v441_v55 }
  0xa7   : > { %823 = vmatmul.f32.vlgmr.msra.gmra.mxu0 %v720_v26 }
  0xa8   : > { %v489_v60 = vadd.f32 %v488_v57, %v465_v56 }
  0xaa   : > { %845 = vmatmul.f32.vlgmr.msra.gmra.mxu1 %v720_v26  ;;  %v513_v62 = vadd.f32 %v512_v58, %v489_v60 }
  0xab   : > { %v534_v59 = vpop.f32.mrf.mxu1 }
  0xac   : > { %v535_v1 = vadd.f32 %v534_v59, %v513_v62 }
  0xad   : > { %799 = vmatmul.f32.vlgmr.msrb.gmra.mxu3 %v722_v38 }
 0x112   : > { %v640_v0 = vpop.f32.mrf.mxu1 }
 0x114   : > { %v616_v63 = vpop.f32.mrf.mxu0 }
 0x118   : > { %v566_v61 = vpop.f32.mrf.mxu2 }
 0x119   : > { %v567_v4 = vadd.f32 %v566_v61, %v535_v1 }
 0x11c   : > { %v726_v6 = vpop.f32.mrf.mxu0 }
 0x11f   : > { %v752_v8 = vpop.f32.mrf.mxu1 }
 0x120   : > { %v592_v2 = vpop.f32.mrf.mxu3  ;;  %v664_v3 = vpop.f32.mrf.mxu2  ;;  %v753_v10 = vadd.f32 %v752_v8, %v726_v6 }
 0x121   : > { %v593_v5 = vadd.f32 %v592_v2, %v567_v4 }
 0x123   : > { %v617_v9 = vadd.f32 %v616_v63, %v593_v5 }
 0x124   : > { %v824_v15 = vpop.f32.mrf.mxu0 }
 0x125   : > { %v641_v12 = vadd.f32 %v640_v0, %v617_v9 }
 0x127   : > { %v665_v16 = vadd.f32 %v664_v3, %v641_v12  ;;  %v846_v18 = vpop.f32.mrf.mxu1 }
 0x128   : > { %v686_v7 = vpop.f32.mrf.mxu3  ;;  %v776_v11 = vpop.f32.mrf.mxu2 }
 0x129   : > { %v777_v13 = vadd.f32 %v776_v11, %v753_v10  ;;  %v687_v20 = vadd.f32 %v686_v7, %v665_v16 }
 0x130   : > { %v800_v14 = vpop.f32.mrf.mxu3 }
 0x131   : > { %v801_v17 = vadd.f32 %v800_v14, %v777_v13 }
 0x133   : > { %v825_v19 = vadd.f32 %v824_v15, %v801_v17 }
 0x135   : > { %v847_v21 = vadd.f32 %v846_v18, %v825_v19 }
 0x137   : > { %v849_v23 = vadd.f32 %v847_v21, %v687_v20 }
 0x139   : > { %v856_v24 = vadd.f32 %v854_v22, %v849_v23 }
 0x13b   : > { %857 = vst [vmem:[%s309_s9] sm:$0xff] %v856_v24 }
 0x13c   : > { %1081 = shalt.err (!%p1078_p5)
}
 0x13d   : > { %993 = dma.vmem_to_hbm [thread:$0]  (%p1208_p4), %s873_s10, 128, %s875_s11, %s859_s20  }
 0x13e PF: > { %p999_p6 = scmp.ge.s32.totalorder %s1132_s21, 2  ;;  %s886_s23 = sand.u32 1, %s1112_s18  }
 0x13f   : > { %s887_s25 = scalar_lea.sflag [#allocation3], %s886_s23 }
 0x140   : > { %p996_p7 = pnand %p999_p6, %p1215_p8 }
 0x142   : > { %p997_p9 = pneg %p996_p7 }
 0x144   : > { %1107 = dma.done.wait (%p997_p9), %s887_s25, 128  }
 0x145   : > { %1109 = vsyncadd (%p997_p9), %s887_s25, 4294967168  ;;  %s18_s21 = sadd.s32 1, %s1132_s21   ;;  %s1296_s18 = smov %s1116_s0 }
 0x146   : > { %p15_p10 = scmp.ge.s32.totalorder %s18_s21, 4   ;;  %s1297_s0 = smov %s1120_s19 }
 0x147   : > { %s1298_s19 = smov %s1221_s29  ;;  %s1299_s20 = smov %s1128_s2 }
 0x148   : > { %s1300_s2 = smov %s1302_s24  ;;  %17 = sbr.rel (!%p15_p10) target bundleno = 4 (0x4), region = 83 }
 0x14d   :  { %893 = vsyncpa [#allocation3], 1 }
 0x14e   :  { %895 = vsyncpa [#allocation3 + $0x1], 1 }

</bundles_post_ra>
